<compile_context>
chip_gen: v6e
topology: v6e:2x2x1
jax: 0.10.0
libtpu: 0.0.40
codegen_flags: <defaults>
</compile_context>

<pallas_src>
import functools

import jax
import jax.numpy as jnp
from jax.experimental import pallas as pl
from jax.experimental.pallas import tpu as pltpu

_VMEM_LIMIT_BYTES = 48 * 1024 * 1024      # safe on v5e/v6e (128 MiB) and v7x (64 MiB)
_BYTE_BUDGET = 4 * 1024 * 1024            # native-dtype bytes per input block
_ELEM_CAP = 2 * 1024 * 1024               # bounds f32 intermediate footprint
_SINGLE_TILE_MAX_LANES = 32 * 1024        # single-lane-tile fast path threshold
_LANE_TILE = 2048                         # lane tile for very large H*W


def _round_up(x, m):
    return ((x + m - 1) // m) * m


def _kl_tile(pred_ref, target_ref, *, L=None, TL=None, j=None, mask_lanes=False):
    """Elementwise KL contributions for the current (TM, TL) tile, in f32."""
    q = pred_ref[...].astype(jnp.float32)    # predicted distribution
    p = target_ref[...].astype(jnp.float32)  # target distribution

    if mask_lanes:
        lane = jax.lax.broadcasted_iota(jnp.int32, p.shape, dimension=1) + j * TL
        valid = lane < L
        # Neutral values for out-of-bounds lanes: p=0, q=1 -> contribution 0.
        p = jnp.where(valid, p, 0.0)
        q = jnp.where(valid, q, 1.0)

    # kl = xlogy(p, p) - p*log(q) = p * (log(p) - log(q)); p == 0 -> exactly 0.
    return p * (jnp.log(jnp.where(p > 0, p, 1.0)) - jnp.log(q))


def _kl_rowsum_single(pred_ref, target_ref, out_ref):
    """Single lane tile per row: one shot row sums."""
    kl = _kl_tile(pred_ref, target_ref)
    out_ref[...] = jnp.sum(kl, axis=-1, keepdims=True)


def _kl_rowsum_tiled(pred_ref, target_ref, out_ref, acc_ref, *, L, TL, mask_lanes):
    """Lane-tiled path: lane-dense (TM, 128) accumulation across the j axis."""
    j = pl.program_id(1)
    kl = _kl_tile(pred_ref, target_ref, L=L, TL=TL, j=j, mask_lanes=mask_lanes)

    @pl.when(j == 0)
    def _init():
        acc_ref[...] = jnp.zeros_like(acc_ref)

    # Fold TL lanes into 128 with lane-aligned static slices (pure VPU adds,
    # no XLU reduce and no narrow masked store per grid step).
    nchunks = TL // 128
    partial = kl[:, 0:128]
    for c in range(1, nchunks):
        partial = partial + kl[:, c * 128:(c + 1) * 128]
    acc_ref[...] += partial

    @pl.when(j == pl.num_programs(1) - 1)
    def _finish():
        out_ref[...] = jnp.sum(acc_ref[...], axis=-1, keepdims=True)


def _choose_tiles(N, L, itemsize):
    """Pick (TM, TL) from a native-dtype byte budget per input block."""
    # Sublane packing: 8 rows for 32-bit, 16 for 16-bit, 32 for 8-bit dtypes.
    row_mult = {4: 8, 2: 16, 1: 32}.get(itemsize, 8)
    l_pad = _round_up(L, 128)

    elems_budget = min(_BYTE_BUDGET // itemsize, _ELEM_CAP)

    if l_pad <= _SINGLE_TILE_MAX_LANES and (elems_budget // l_pad) >= row_mult:
        TL, tl_pad = L, l_pad            # whole spatial extent in one lane tile
    else:
        TL, tl_pad = _LANE_TILE, _LANE_TILE

    TM = max(row_mult, (elems_budget // tl_pad) // row_mult * row_mult)
    TM = min(TM, _round_up(N, row_mult))
    # Guarantee >= 2 row tiles when there are enough rows, so the "parallel"
    # row axis can be sharded across two TensorCores (v7x megacore).
    if N >= 2 * row_mult:
        TM = min(TM, _round_up((N + 1) // 2, row_mult))
    return TM, TL


@functools.partial(jax.jit, static_argnames=("reduction",))
def kl_div_loss_2d(pred, target, reduction="mean"):
    if reduction not in ("mean", "sum", "none"):
        raise ValueError(f"unsupported reduction: {reduction}")

    B, C, H, W = pred.shape
    N, L = B * C, H * W
    itemsize = jnp.dtype(pred.dtype).itemsize
    TM, TL = _choose_tiles(N, L, itemsize)
    n_row_tiles = pl.cdiv(N, TM)

    # Views only (no pad, no dtype change): each row is one spatial distribution.
    q2d = pred.reshape(N, L)
    p2d = target.reshape(N, L)

    cost = pl.CostEstimate(
        flops=4 * N * L,
        transcendentals=2 * N * L,
        bytes_accessed=N * L * (itemsize + jnp.dtype(target.dtype).itemsize) + N * 4,
    )
    out_shape = jax.ShapeDtypeStruct((N, 1), jnp.float32)

    if TL == L:
        # Fast path: no inner grid axis, no masking, no accumulator.
        rows = pl.pallas_call(
            _kl_rowsum_single,
            out_shape=out_shape,
            grid=(n_row_tiles,),
            in_specs=[
                pl.BlockSpec((TM, L), lambda i: (i, 0)),
                pl.BlockSpec((TM, L), lambda i: (i, 0)),
            ],
            out_specs=pl.BlockSpec((TM, 1), lambda i: (i, 0)),
            compiler_params=pltpu.CompilerParams(
                dimension_semantics=("parallel",),
                vmem_limit_bytes=_VMEM_LIMIT_BYTES,
            ),
            cost_estimate=cost,
        )(q2d, p2d)
    else:
        n_lane_tiles = pl.cdiv(L, TL)
        mask_lanes = (L % TL) != 0
        kernel = functools.partial(
            _kl_rowsum_tiled, L=L, TL=TL, mask_lanes=mask_lanes)
        rows = pl.pallas_call(
            kernel,
            out_shape=out_shape,
            grid=(n_row_tiles, n_lane_tiles),
            in_specs=[
                pl.BlockSpec((TM, TL), lambda i, j: (i, j)),
                pl.BlockSpec((TM, TL), lambda i, j: (i, j)),
            ],
            out_specs=pl.BlockSpec((TM, 1), lambda i, j: (i, 0)),
            scratch_shapes=[pltpu.VMEM((TM, 128), jnp.float32)],
            compiler_params=pltpu.CompilerParams(
                dimension_semantics=("parallel", "arbitrary"),
                vmem_limit_bytes=_VMEM_LIMIT_BYTES,
            ),
            cost_estimate=cost,
        )(q2d, p2d)

    kl = rows[:, 0].reshape(B, C)
    if reduction == "mean":
        return jnp.mean(kl)
    if reduction == "sum":
        return jnp.sum(kl)
    return kl


class KLDivLoss:
    """JAX/Pallas port of mmdepth KLDivLoss (kornia.kl_div_loss_2d)."""

    def __init__(self, reduction="mean"):
        self.reduction = reduction

    def __call__(self, pred, target):
        return kl_div_loss_2d(pred, target, self.reduction)


def _reference(pred, target, reduction="mean"):
    p = target.astype(jnp.float32)
    q = pred.astype(jnp.float32)
    plogp = jnp.where(p > 0, p * jnp.log(jnp.where(p > 0, p, 1.0)), 0.0)
    kl = jnp.sum(plogp - p * jnp.log(q), axis=(2, 3))  # (B, C)
    if reduction == "mean":
        return jnp.mean(kl)
    if reduction == "sum":
        return jnp.sum(kl)
    return kl


def _make_inputs(key, B, C, H, W, dtype=jnp.float32):
    k1, k2 = jax.random.split(key)
    lp = jax.random.normal(k1, (B, C, H, W), dtype=jnp.float32)
    lt = jax.random.normal(k2, (B, C, H, W), dtype=jnp.float32)
    pred = jax.nn.softmax(lp.reshape(B, C, H * W), axis=-1).reshape(B, C, H, W)
    tgt = jax.nn.softmax(lt.reshape(B, C, H * W), axis=-1).reshape(B, C, H, W)
    return pred.astype(dtype), tgt.astype(dtype)


def _check(got, ref, tag):
    assert jnp.allclose(got, ref, rtol=1e-4, atol=1e-5), (tag, got, ref)


if __name__ == "__main__":
    root = jax.random.PRNGKey(0)
    k_a, k_b, k_c, k_d, k_e = jax.random.split(root, 5)

    # Primary module-sized example: B=2, C=4, H=W=16.
    pred, target = _make_inputs(k_a, 2, 4, 16, 16)
    loss_mod = KLDivLoss(reduction="mean")
    out = jax.block_until_ready(loss_mod(pred, target))
    _check(out, _reference(pred, target, "mean"), "mean")

    for red in ("none", "sum"):
        o = jax.block_until_ready(kl_div_loss_2d(pred, target, red))
        _check(o, _reference(pred, target, red), red)

    # Ragged rows: N = 3*5 = 15 (not a multiple of the sublane row tile).
    pred2, target2 = _make_inputs(k_b, 3, 5, 16, 16)
    o2 = jax.block_until_ready(kl_div_loss_2d(pred2, target2, "none"))
    _check(o2, _reference(pred2, target2, "none"), "ragged rows")

    # Single-lane-tile path with L not a multiple of 128: H*W = 10000.
    pred3, target3 = _make_inputs(k_c, 2, 4, 100, 100)
    o3 = jax.block_until_ready(kl_div_loss_2d(pred3, target3, "mean"))
    _check(o3, _reference(pred3, target3, "mean"), "single-tile ragged lanes")

    # Lane-tiled path with ragged spatial tail: H*W = 40000 > 32768, % 2048 != 0.
    pred4, target4 = _make_inputs(k_d, 2, 4, 200, 200)
    o4 = jax.block_until_ready(kl_div_loss_2d(pred4, target4, "mean"))
    _check(o4, _reference(pred4, target4, "mean"), "lane-tiled")

    # Native bf16 inputs stream at half the HBM bytes; math is f32 in-kernel.
    pred5, target5 = _make_inputs(k_e, 2, 4, 16, 16, dtype=jnp.bfloat16)
    o5 = jax.block_until_ready(kl_div_loss_2d(pred5, target5, "mean"))
    _check(o5, _reference(pred5, target5, "mean"), "bf16")

    print("KERNEL_OK")
</pallas_src>

<mosaic_0001>
module attributes {stable_mosaic.version = 11 : i64} {
  func.func @_kl_rowsum_single(%arg0: i32, %arg1: memref<8x256xf32, #tpu.memory_space<vmem>>, %arg2: memref<8x256xf32, #tpu.memory_space<vmem>>, %arg3: memref<8x1xf32, #tpu.memory_space<vmem>>) attributes {dimension_semantics = [#tpu.dimension_semantics<parallel>], iteration_bounds = array<i64: 1>, scalar_prefetch = 0 : i64, scratch_operands = 0 : i64, tpu.core_type = #tpu.core_type<tc>, window_params = [{transform_indices = @transform_0, window_bounds = array<i64: 8, 256>}, {transform_indices = @transform_1, window_bounds = array<i64: 8, 256>}, {transform_indices = @transform_2, window_bounds = array<i64: 8, 1>}]} {
    %c0 = arith.constant 0 : index
    %c0_0 = arith.constant 0 : index
    %0 = vector.load %arg1[%c0, %c0_0] : memref<8x256xf32, #tpu.memory_space<vmem>>, vector<8x256xf32>
    %c0_1 = arith.constant 0 : index
    %c0_2 = arith.constant 0 : index
    %1 = vector.load %arg2[%c0_1, %c0_2] : memref<8x256xf32, #tpu.memory_space<vmem>>, vector<8x256xf32>
    %cst = arith.constant 0.000000e+00 : f32
    %2 = vector.broadcast %cst : f32 to vector<8x256xf32>
    %3 = arith.cmpf ogt, %1, %2 : vector<8x256xf32>
    %cst_3 = arith.constant 1.000000e+00 : f32
    %4 = vector.broadcast %cst_3 : f32 to vector<8x256xf32>
    %5 = arith.select %3, %1, %4 : vector<8x256xi1>, vector<8x256xf32>
    %6 = math.log %5 : vector<8x256xf32>
    %7 = math.log %0 : vector<8x256xf32>
    %8 = arith.subf %6, %7 : vector<8x256xf32>
    %9 = arith.mulf %1, %8 : vector<8x256xf32>
    %cst_4 = arith.constant dense<0.000000e+00> : vector<8xf32>
    %10 = vector.multi_reduction <add>, %9, %cst_4 [1] : vector<8x256xf32> to vector<8xf32>
    %11 = vector.shape_cast %10 : vector<8xf32> to vector<8x1xf32>
    %c0_5 = arith.constant 0 : index
    %c0_6 = arith.constant 0 : index
    %12 = vector.load %arg3[%c0_5, %c0_6] : memref<8x1xf32, #tpu.memory_space<vmem>>, vector<8x1xf32>
    tpu.vector_store %arg3[%c0_5, %c0_6], %11 {strides = array<i32>} : memref<8x1xf32, #tpu.memory_space<vmem>>, vector<8x1xf32>,
    return
  }
  func.func @transform_0(%arg0: i32) -> (i32, i32) {
    %c0_i32 = arith.constant 0 : i32
    %c0_i32_0 = arith.constant 0 : i32
    return %arg0, %c0_i32 : i32, i32
  }
  func.func @transform_1(%arg0: i32) -> (i32, i32) {
    %c0_i32 = arith.constant 0 : i32
    %c0_i32_0 = arith.constant 0 : i32
    return %arg0, %c0_i32 : i32, i32
  }
  func.func @transform_2(%arg0: i32) -> (i32, i32) {
    %c0_i32 = arith.constant 0 : i32
    %c0_i32_0 = arith.constant 0 : i32
    return %arg0, %c0_i32 : i32, i32
  }
}

</mosaic_0001>

<bundles_post_ra>
// kernel: kl_div_loss_2d.1
= control target key start
LH: loop header
LB: loop body
LE: loop exit
PB: predicated region body
PF: predicated region fallthrough
CT: control target
= control target key end

     0   :  { %vm34_vm2 = vcmask 7168   ;;  %s78_s0 = inlined_call_operand.vmem [shape: f32[8,256], index: 0, kind: input, shape index: {}]   ;;  %s79_s1 = inlined_call_operand.vmem [shape: f32[8,256], index: 1, kind: input, shape index: {}]   ;;  %s80_s2 = inlined_call_operand.vmem [shape: f32[8,1], index: 2, kind: output, shape index: {}]  }
   0x1   :  { %v11_v0 = vld [vmem:[%s78_s0] sm:$0xff]  ;;  %v12_v1 = vld [vmem:[%s78_s0 + $0x8] sm:$0xff] }
   0x2   :  { %v13_v2 = vld [vmem:[%s79_s1] sm:$0xff]  ;;  %v14_v3 = vld [vmem:[%s79_s1 + $0x8] sm:$0xff]  ;;  %40 = vlog2.f32 %v11_v0 }
   0x3   :  { %vm15_vm0 = vcmp.gt.f32.partialorder %v13_v2, 0.0  ;;  %vm16_vm1 = vcmp.gt.f32.partialorder %v14_v3, 0.0  ;;  %42 = vlog2.f32 %v12_v1 }
   0x4   :  { %v17_v4 = vsel %vm15_vm0, %v13_v2, 1.0  ;;  %v18_v5 = vsel %vm16_vm1, %v14_v3, 1.0 }
   0x5   :  { %44 = vlog2.f32 %v17_v4 }
   0x6   :  { %46 = vlog2.f32 %v18_v5 }
   0xf   :  { %v41_v6 = vpop.eup %40 }
  0x10   :  { %v43_v7 = vpop.eup %42  ;;  %v24_v8 = vmul.f32 0.6931472, %v41_v6 }
  0x11   :  { %v26_v10 = vmul.f32 0.6931472, %v43_v7 }
  0x12   :  { %v45_v9 = vpop.eup %44 }
  0x13   :  { %v47_v11 = vpop.eup %46  ;;  %v20_v12 = vmul.f32 0.6931472, %v45_v9 }
  0x14   :  { %v22_v13 = vmul.f32 0.6931472, %v47_v11 }
  0x15   :  { %v27_v14 = vsub.f32 %v20_v12, %v24_v8 }
  0x16   :  { %v28_v15 = vsub.f32 %v22_v13, %v26_v10 }
  0x17   :  { %v29_v16 = vmul.f32 %v27_v14, %v13_v2 }
  0x18   :  { %v30_v17 = vmul.f32 %v28_v15, %v14_v3 }
  0x1a   :  { %v31_v18 = vadd.f32 %v30_v17, %v29_v16 }
  0x1c   :  { %32 = vadd.xlane.f32.xlu0 %v31_v18 }
  0xa5   :  { %v33_v19 = vpop.xlane.xlu0 %32 }
  0xa6   :  { %35 = vst.msk [vmem:[%s80_s2] sm:$0xff] %vm34_vm2, %v33_v19 }

</bundles_post_ra>
